<compile_context>
chip_gen: v6e
topology: v6e:2x2x1
jax: 0.10.0
libtpu: 0.0.40
codegen_flags: <defaults>
</compile_context>

<pallas_src>
import functools

import jax
import jax.numpy as jnp
from jax.experimental import pallas as pl
from jax.experimental.pallas import tpu as pltpu


def _gaussian_sampler_kernel(x_ref, w_ref, b_ref, eps_ref,
                             sample_ref, mu_ref, sp_ref):
    D = mu_ref.shape[-1]
    x = x_ref[...]
    # Fused Linear(D -> 2D): a single MXU matmul with N = 2D.
    stats = jnp.dot(x, w_ref[...],
                    preferred_element_type=jnp.float32,
                    precision=jax.lax.Precision.HIGHEST) + b_ref[...]
    # First half -> softplus -> covariance diagonal; second half -> mean.
    sp = jax.nn.softplus(stats[:, :D])
    mu = stats[:, D:]
    mu_ref[...] = mu
    sp_ref[...] = sp
    # Reparameterized sample: mu + L @ eps with L = diag(sqrt(sp)).
    sample_ref[...] = mu + jnp.sqrt(sp) * eps_ref[...]


def _pick_tm(M, cap=1024):
    """Largest row tile <= cap that divides M (single block when M is small)."""
    if M <= cap:
        return M
    for tm in (cap, 512, 256, 128, 64, 32, 16, 8):
        if tm <= M and M % tm == 0:
            return tm
    return M  # ragged M: fall back to one big block


def gaussian_sampler_forward(x, weight, bias, eps, *, max_tm=1024):
    """x: (B, S, D) f32.  weight: (2D, D) torch layout.  bias: (2D,).  eps: (B, S, D)."""
    B, S, D = x.shape
    M = B * S

    x2 = x.reshape(M, D)
    eps2 = eps.reshape(M, D)

    # torch Linear: y = x @ weight.T + bias, done as one fused (D, 2D) matmul.
    w_full = weight.T                    # (D, 2D)
    b_full = bias.reshape(1, 2 * D)      # (1, 2D)

    tm = _pick_tm(M, max_tm)
    grid = (M // tm,)

    row_spec = pl.BlockSpec((tm, D), lambda i: (i, 0))
    w_spec = pl.BlockSpec((D, 2 * D), lambda i: (0, 0))
    b_spec = pl.BlockSpec((1, 2 * D), lambda i: (0, 0))

    out_shape = (
        jax.ShapeDtypeStruct((M, D), jnp.float32),  # sample
        jax.ShapeDtypeStruct((M, D), jnp.float32),  # mu
        jax.ShapeDtypeStruct((M, D), jnp.float32),  # softplus diag of cov
    )

    sample2, mu2, sp2 = pl.pallas_call(
        _gaussian_sampler_kernel,
        out_shape=out_shape,
        grid_spec=pltpu.PrefetchScalarGridSpec(
            num_scalar_prefetch=0,
            grid=grid,
            in_specs=[row_spec, w_spec, b_spec, row_spec],
            out_specs=[row_spec, row_spec, row_spec],
        ),
        compiler_params=pltpu.CompilerParams(
            dimension_semantics=("parallel",)),
    )(x2, w_full, b_full, eps2)

    sample = sample2.reshape(B, S, D)
    mu = mu2.reshape(B, S, D)
    sp = sp2.reshape(B, S, D)
    # diag_embed: (B, S, D) -> (B, S, D, D) covariance matrix (layout-only glue).
    # Note: this writes D x more HBM than the kernel itself; downstream code
    # that only needs the diagonal should use `sp` instead of `std`.
    std = sp[..., :, None] * jnp.eye(D, dtype=sp.dtype)
    return sample, mu, std


def init_params(input_size, key):
    """Deterministic init matching the module: xavier_uniform_ weight, zero bias."""
    fan_in, fan_out = input_size, 2 * input_size
    bound = jnp.sqrt(6.0 / (fan_in + fan_out))
    weight = jax.random.uniform(key, (2 * input_size, input_size),
                                dtype=jnp.float32, minval=-bound, maxval=bound)
    bias = jnp.zeros((2 * input_size,), dtype=jnp.float32)
    return weight, bias


if __name__ == "__main__":
    B, S, D = 2, 8, 32  # batch, seq, input_size
    key = jax.random.PRNGKey(0)
    k_x, k_w, k_eps = jax.random.split(key, 3)

    x = jax.random.normal(k_x, (B, S, D), dtype=jnp.float32)
    weight, bias = init_params(D, k_w)
    eps = jax.random.normal(k_eps, (B, S, D), dtype=jnp.float32)

    sample, mu, std = jax.jit(
        functools.partial(gaussian_sampler_forward, max_tm=1024)
    )(x, weight, bias, eps)
    jax.block_until_ready((sample, mu, std))

    # Pure-JAX reference check.
    stats_ref = (jnp.dot(x.reshape(-1, D), weight.T,
                         precision=jax.lax.Precision.HIGHEST)
                 .reshape(B, S, 2 * D) + bias)
    mu_ref = stats_ref[:, :, D:]
    sp_ref = jax.nn.softplus(stats_ref[:, :, :D])
    sample_ref = mu_ref + jnp.sqrt(sp_ref) * eps
    std_ref = sp_ref[..., :, None] * jnp.eye(D, dtype=jnp.float32)

    assert sample.shape == (B, S, D) and mu.shape == (B, S, D) and std.shape == (B, S, D, D)
    assert jnp.allclose(sample, sample_ref, atol=1e-5)
    assert jnp.allclose(mu, mu_ref, atol=1e-5)
    assert jnp.allclose(std, std_ref, atol=1e-5)

    print("KERNEL_OK")
</pallas_src>

<mosaic_0001>
module attributes {stable_mosaic.version = 11 : i64} {
  func.func @_gaussian_sampler_kernel(%arg0: i32, %arg1: memref<16x32xf32, #tpu.memory_space<vmem>>, %arg2: memref<32x64xf32, #tpu.memory_space<vmem>>, %arg3: memref<1x64xf32, #tpu.memory_space<vmem>>, %arg4: memref<16x32xf32, #tpu.memory_space<vmem>>, %arg5: memref<16x32xf32, #tpu.memory_space<vmem>>, %arg6: memref<16x32xf32, #tpu.memory_space<vmem>>, %arg7: memref<16x32xf32, #tpu.memory_space<vmem>>) attributes {dimension_semantics = [#tpu.dimension_semantics<parallel>], iteration_bounds = array<i64: 1>, scalar_prefetch = 0 : i64, scratch_operands = 0 : i64, tpu.core_type = #tpu.core_type<tc>, window_params = [{transform_indices = @transform_0, window_bounds = array<i64: 16, 32>}, {pipeline_mode = #tpu.pipeline_mode<synchronous>, transform_indices = @transform_1, window_bounds = array<i64: 32, 64>}, {pipeline_mode = #tpu.pipeline_mode<synchronous>, transform_indices = @transform_2, window_bounds = array<i64: 1, 64>}, {transform_indices = @transform_3, window_bounds = array<i64: 16, 32>}, {transform_indices = @transform_4, window_bounds = array<i64: 16, 32>}, {transform_indices = @transform_5, window_bounds = array<i64: 16, 32>}, {transform_indices = @transform_6, window_bounds = array<i64: 16, 32>}]} {
    %c0 = arith.constant 0 : index
    %c0_0 = arith.constant 0 : index
    %0 = vector.load %arg1[%c0, %c0_0] : memref<16x32xf32, #tpu.memory_space<vmem>>, vector<16x32xf32>
    %c0_1 = arith.constant 0 : index
    %c0_2 = arith.constant 0 : index
    %1 = vector.load %arg2[%c0_1, %c0_2] : memref<32x64xf32, #tpu.memory_space<vmem>>, vector<32x64xf32>
    %cst = arith.constant dense<0.000000e+00> : vector<16x64xf32>
    %2 = tpu.matmul %0, %1, %cst {dimension_numbers = #tpu.dot_dimension_numbers<[1], [0], [0], [1], [0, 0, 1, 1], [], []>, precision = #tpu.contract_precision<fp32>} : vector<16x32xf32>, vector<32x64xf32>, vector<16x64xf32> -> vector<16x64xf32>
    %c0_3 = arith.constant 0 : index
    %c0_4 = arith.constant 0 : index
    %3 = vector.load %arg3[%c0_3, %c0_4] : memref<1x64xf32, #tpu.memory_space<vmem>>, vector<1x64xf32>
    %4 = vector.broadcast %3 : vector<1x64xf32> to vector<16x64xf32>
    %5 = arith.addf %2, %4 : vector<16x64xf32>
    %6 = vector.extract_strided_slice %5 {offsets = [0, 0], sizes = [16, 32], strides = [1, 1]} : vector<16x64xf32> to vector<16x32xf32>
    %cst_5 = arith.constant 0.000000e+00 : f32
    %7 = vector.broadcast %cst_5 : f32 to vector<16x32xf32>
    %8 = arith.maximumf %6, %7 : vector<16x32xf32>
    %9 = vector.broadcast %cst_5 : f32 to vector<16x32xf32>
    %10 = arith.subf %6, %9 : vector<16x32xf32>
    %11 = arith.cmpf one, %10, %10 : vector<16x32xf32>
    %12 = vector.broadcast %cst_5 : f32 to vector<16x32xf32>
    %13 = arith.addf %6, %12 : vector<16x32xf32>
    %14 = math.absf %10 : vector<16x32xf32>
    %cst_6 = arith.constant 0.000000e+00 : f32
    %15 = vector.broadcast %cst_6 : f32 to vector<16x32xf32>
    %16 = arith.subf %15, %14 : vector<16x32xf32>
    %17 = math.exp %16 : vector<16x32xf32>
    %18 = math.log1p %17 : vector<16x32xf32>
    %19 = arith.addf %8, %18 : vector<16x32xf32>
    %20 = arith.select %11, %13, %19 : vector<16x32xi1>, vector<16x32xf32>
    %21 = vector.extract_strided_slice %5 {offsets = [0, 32], sizes = [16, 32], strides = [1, 1]} : vector<16x64xf32> to vector<16x32xf32>
    %c0_7 = arith.constant 0 : index
    %c0_8 = arith.constant 0 : index
    %22 = vector.load %arg6[%c0_7, %c0_8] : memref<16x32xf32, #tpu.memory_space<vmem>>, vector<16x32xf32>
    tpu.vector_store %arg6[%c0_7, %c0_8], %21 {strides = array<i32>} : memref<16x32xf32, #tpu.memory_space<vmem>>, vector<16x32xf32>,
    %c0_9 = arith.constant 0 : index
    %c0_10 = arith.constant 0 : index
    %23 = vector.load %arg7[%c0_9, %c0_10] : memref<16x32xf32, #tpu.memory_space<vmem>>, vector<16x32xf32>
    tpu.vector_store %arg7[%c0_9, %c0_10], %20 {strides = array<i32>} : memref<16x32xf32, #tpu.memory_space<vmem>>, vector<16x32xf32>,
    %24 = math.sqrt %20 : vector<16x32xf32>
    %c0_11 = arith.constant 0 : index
    %c0_12 = arith.constant 0 : index
    %25 = vector.load %arg4[%c0_11, %c0_12] : memref<16x32xf32, #tpu.memory_space<vmem>>, vector<16x32xf32>
    %26 = arith.mulf %24, %25 : vector<16x32xf32>
    %27 = arith.addf %21, %26 : vector<16x32xf32>
    %c0_13 = arith.constant 0 : index
    %c0_14 = arith.constant 0 : index
    %28 = vector.load %arg5[%c0_13, %c0_14] : memref<16x32xf32, #tpu.memory_space<vmem>>, vector<16x32xf32>
    tpu.vector_store %arg5[%c0_13, %c0_14], %27 {strides = array<i32>} : memref<16x32xf32, #tpu.memory_space<vmem>>, vector<16x32xf32>,
    return
  }
  func.func @transform_0(%arg0: i32) -> (i32, i32) {
    %c0_i32 = arith.constant 0 : i32
    %c0_i32_0 = arith.constant 0 : i32
    return %arg0, %c0_i32 : i32, i32
  }
  func.func @transform_1(%arg0: i32) -> (i32, i32) {
    %c0_i32 = arith.constant 0 : i32
    %c0_i32_0 = arith.constant 0 : i32
    %c0_i32_1 = arith.constant 0 : i32
    return %c0_i32, %c0_i32_0 : i32, i32
  }
  func.func @transform_2(%arg0: i32) -> (i32, i32) {
    %c0_i32 = arith.constant 0 : i32
    %c0_i32_0 = arith.constant 0 : i32
    %c0_i32_1 = arith.constant 0 : i32
    return %c0_i32, %c0_i32_0 : i32, i32
  }
  func.func @transform_3(%arg0: i32) -> (i32, i32) {
    %c0_i32 = arith.constant 0 : i32
    %c0_i32_0 = arith.constant 0 : i32
    return %arg0, %c0_i32 : i32, i32
  }
  func.func @transform_4(%arg0: i32) -> (i32, i32) {
    %c0_i32 = arith.constant 0 : i32
    %c0_i32_0 = arith.constant 0 : i32
    return %arg0, %c0_i32 : i32, i32
  }
  func.func @transform_5(%arg0: i32) -> (i32, i32) {
    %c0_i32 = arith.constant 0 : i32
    %c0_i32_0 = arith.constant 0 : i32
    return %arg0, %c0_i32 : i32, i32
  }
  func.func @transform_6(%arg0: i32) -> (i32, i32) {
    %c0_i32 = arith.constant 0 : i32
    %c0_i32_0 = arith.constant 0 : i32
    return %arg0, %c0_i32 : i32, i32
  }
}

</mosaic_0001>

<bundles_post_ra>
// kernel: gaussian_sampler_forward.1
= control target key start
LH: loop header
LB: loop body
LE: loop exit
PB: predicated region body
PF: predicated region fallthrough
CT: control target
= control target key end

     0   :  { %12 = vsyncpa [#allocation3], 0  ;;  %s1099_s0 = inlined_call_operand.hbm [shape: f32[16,32], index: 0, kind: input, shape index: {}]   ;;  %s1100_s1 = inlined_call_operand.vmem [shape: f32[32,64], index: 1, kind: input, shape index: {}]   ;;  %s1101_s2 = inlined_call_operand.vmem [shape: f32[1,64], index: 2, kind: input, shape index: {}]   ;;  %s1102_s3 = inlined_call_operand.hbm [shape: f32[16,32], index: 3, kind: input, shape index: {}]   ;;  %s1103_s4 = inlined_call_operand.hbm [shape: f32[16,32], index: 4, kind: output, shape index: {0}]   ;;  %s1104_s5 = inlined_call_operand.hbm [shape: f32[16,32], index: 5, kind: output, shape index: {1}]   ;;  %s1105_s6 = inlined_call_operand.vmem [shape: f32[16,32], index: 6, kind: output, shape index: {2}]  }
   0x1   :  { %13 = vsyncpa [#allocation6], 0 }
   0x2   :  { %14 = vsyncpa [#allocation4], 0 }
   0x3   :  { %15 = vsyncpa [#allocation9], 0  ;;  %s933_s21 = smov [#allocation2]  }
   0x4   :  { %s21_s22 = sshll.u32 %s933_s21, 4  ;;  %s22_s22 = int_to_ptr.vmem [resolvable:$true] %s21_s22 }
   0x5   :  { %s853_s23 = scalar_lea.vmem %s22_s22, 256  ;;  %p858_p1 = scmp.lt.s32.totalorder %s22_s22, %s22_s22 }
   0x6   :  { %p854_p0 = scmp.ne.s32.totalorder %s22_s22, %s853_s23  ;;  %p859_p2 = scmp.lt.s32.totalorder %s853_s23, %s853_s23 }
   0x8   :  { %p860_p3 = por %p859_p2, %p858_p1 }
   0xa   :  { %p861_p4 = pnand %p860_p3, %p854_p0 }
   0xc   :  { %864 = shalt.err (!%p861_p4)
}
   0xd   :  { %s934_s24 = smov 128   ;;  %s935_s25 = smov 8  }
   0xe   :  { %27 = dma.hbm_to_vmem [thread:$0]  %s1099_s0, 256, %s22_s22, [#allocation3], %s934_s24, %s934_s24, %s935_s25  }
   0xf   :  { %s936_s28 = smov [#allocation5]  }
  0x10   :  { %s37_s29 = sshll.u32 %s936_s28, 4  ;;  %s38_s29 = int_to_ptr.vmem [resolvable:$true] %s37_s29 }
  0x11   :  { %s873_s30 = scalar_lea.vmem %s38_s29, 256  ;;  %p878_p6 = scmp.lt.s32.totalorder %s38_s29, %s38_s29 }
  0x12   :  { %p874_p5 = scmp.ne.s32.totalorder %s38_s29, %s873_s30  ;;  %p879_p7 = scmp.lt.s32.totalorder %s873_s30, %s873_s30 }
  0x14   :  { %p880_p8 = por %p879_p7, %p878_p6 }
  0x16   :  { %p881_p9 = pnand %p880_p8, %p874_p5 }
  0x18   :  { %884 = shalt.err (!%p881_p9)
}
  0x19   :  { %43 = dma.hbm_to_vmem [thread:$0]  %s1102_s3, 256, %s38_s29, [#allocation6], %s934_s24, %s934_s24, %s935_s25  }
  0x1a   :  { %925 = dma.done.wait [#allocation3], 256  }
  0x1b   :  { %926 = vsyncadd [#allocation3], 4294967040 }
  0x1c   :  { %927 = dma.done.wait [#allocation6], 256  }
  0x1d   :  { %928 = vsyncadd [#allocation6], 4294967040  ;;  %vm63_vm0 = vcmask 261120   ;;  %v55_v0 = vld [vmem:[%s1100_s1 + $0x18] sm:$0xff]  ;;  %v54_v1 = vld [vmem:[%s1100_s1 + $0x10] sm:$0xff]  ;;  %s938_s20 = smov 32  }
  0x1e   :  { %v53_v2 = vld [vmem:[%s1100_s1 + $0x8] sm:$0xff]  ;;  %v997_v3 = vand.u32 4294901760, %v55_v0  ;;  %v999_v4 = vand.u32 4294901760, %v54_v1  ;;  %v52_v6 = vld [vmem:[%s1100_s1] sm:$0xff] }
  0x1f   :  { %v1001_v5 = vand.u32 4294901760, %v53_v2  ;;  %v50_v7 = vld [vmem:[#allocation2] sm:$0xff]  ;;  %v51_v8 = vld [vmem:[#allocation2 + $0x8] sm:$0xff]  ;;  %v1006_v9 = vand.u32 4294901760, %v52_v6 }
  0x20   :  { %v65_v10 = vsel %vm63_vm0, %v50_v7, 0  ;;  %v68_v11 = vsel %vm63_vm0, %v51_v8, 0  ;;  %759 = vmatprep.subr.mxu0 %v997_v3  ;;  %v185_v12 = vsub.f32 %v55_v0, %v997_v3  ;;  %v192_v14 = vsub.f32 %v54_v1, %v999_v4  ;;  %v722_v39 = vld [vmem:[%s1101_s2] ss:$0 sm:$0xff]  ;;  %s937_s2 = smov 96  }
  0x21   :  { %v1012_v13 = vand.u32 4294901760, %v65_v10  ;;  %v1015_v15 = vand.u32 4294901760, %v68_v11  ;;  %760 = vmatpush3.msra.mxu0 %v997_v3  ;;  %v199_v16 = vsub.f32 %v53_v2, %v1001_v5  ;;  %v206_v17 = vsub.f32 %v52_v6, %v1006_v9 }
  0x22   :  { %761 = vmatprep.subr.mxu0 %v999_v4  ;;  %v186_v18 = vand.u32 4294901760, %v185_v12  ;;  %v193_v20 = vand.u32 4294901760, %v192_v14 }
  0x23   :  { %v140_v19 = vsub.f32 %v65_v10, %v1012_v13  ;;  %v150_v21 = vsub.f32 %v68_v11, %v1015_v15  ;;  %778 = vmatprep.mubr.f32.mxu1 %v1012_v13  ;;  %762 = vmatpush3.msra.mxu0 %v999_v4  ;;  %v200_v22 = vand.u32 4294901760, %v199_v16  ;;  %v207_v23 = vand.u32 4294901760, %v206_v17 }
  0x24   :  { %763 = vmatprep.subr.mxu0 %v1001_v5  ;;  %v187_v24 = vsub.f32 %v185_v12, %v186_v18  ;;  %v194_v26 = vsub.f32 %v192_v14, %v193_v20 }
  0x25   :  { %v141_v25 = vand.u32 4294901760, %v140_v19  ;;  %v151_v27 = vand.u32 4294901760, %v150_v21  ;;  %764 = vmatpush3.msra.mxu0 %v1001_v5  ;;  %v201_v28 = vsub.f32 %v199_v16, %v200_v22  ;;  %v208_v29 = vsub.f32 %v206_v17, %v207_v23 }
  0x26   :  { %765 = vmatprep.subr.mxu0 %v1006_v9  ;;  %v188_v30 = vand.u32 4294901760, %v187_v24  ;;  %v195_v32 = vand.u32 4294901760, %v194_v26 }
  0x27   :  { %v142_v31 = vsub.f32 %v140_v19, %v141_v25  ;;  %v152_v33 = vsub.f32 %v150_v21, %v151_v27  ;;  %766 = vmatpush3.msra.mxu0 %v1006_v9  ;;  %v202_v36 = vand.u32 4294901760, %v201_v28  ;;  %v209_v37 = vand.u32 4294901760, %v208_v29 }
  0x28   :  { %770 = vmatprep.subr.mxu1 %v188_v30  ;;  %781 = vmatprep.subr.mxu0 %v185_v12 }
  0x29   :  { %v143_v34 = vand.u32 4294901760, %v142_v31  ;;  %v153_v35 = vand.u32 4294901760, %v152_v33  ;;  %771 = vmatpush3.msra.mxu1 %v188_v30 }
  0x2a   :  { %772 = vmatprep.subr.mxu1 %v195_v32 }
  0x2b   :  { %767 = vmatprep.mubr.f32.mxu0 %v143_v34  ;;  %773 = vmatpush3.msra.mxu1 %v195_v32  ;;  %v660_v34 = vld [vmem:[#allocation5] sm:$0xff] }
  0x2c   :  { %768 = vmatmul.mubr.f32.vlgmr.msra.gmra.mxu0 %v153_v35  ;;  %774 = vmatprep.subr.mxu1 %v202_v36 }
  0x2d   :  { %782 = vmatpush3.msra.mxu0 %v185_v12  ;;  %775 = vmatpush3.msra.mxu1 %v202_v36 }
  0x2e   :  { %783 = vmatprep.subr.mxu0 %v192_v14  ;;  %776 = vmatprep.subr.mxu1 %v209_v37 }
  0x2f   :  { %784 = vmatpush3.msra.mxu0 %v192_v14  ;;  %777 = vmatpush3.msra.mxu1 %v209_v37 }
  0x30   :  { %785 = vmatprep.subr.mxu0 %v199_v16  ;;  %779 = vmatmul.mubr.f32.vlgmr.msra.gmra.mxu1 %v1015_v15 }
  0x31   :  { %786 = vmatpush3.msra.mxu0 %v199_v16  ;;  %792 = vmatprep.subr.mxu1 %v997_v3 }
  0x32   :  { %787 = vmatprep.subr.mxu0 %v206_v17  ;;  %789 = vmatprep.mubr.f32.mxu0 %v140_v19 }
  0x33   :  { %788 = vmatpush3.msra.mxu0 %v206_v17  ;;  %793 = vmatpush3.msra.mxu1 %v997_v3 }
  0x34   :  { %790 = vmatmul.mubr.f32.vlgmr.msra.gmra.mxu0 %v150_v21  ;;  %794 = vmatprep.subr.mxu1 %v999_v4 }
  0x35   :  { %803 = vmatprep.subr.mxu0 %v186_v18  ;;  %795 = vmatpush3.msra.mxu1 %v999_v4 }
  0x36   :  { %804 = vmatpush3.msra.mxu0 %v186_v18  ;;  %796 = vmatprep.subr.mxu1 %v1001_v5 }
  0x37   :  { %805 = vmatprep.subr.mxu0 %v193_v20  ;;  %797 = vmatpush3.msra.mxu1 %v1001_v5 }
  0x38   :  { %806 = vmatpush3.msra.mxu0 %v193_v20  ;;  %798 = vmatprep.subr.mxu1 %v1006_v9 }
  0x39   :  { %807 = vmatprep.subr.mxu0 %v200_v22  ;;  %799 = vmatpush3.msra.mxu1 %v1006_v9 }
  0x3a   :  { %800 = vmatprep.mubr.f32.mxu1 %v141_v25  ;;  %808 = vmatpush3.msra.mxu0 %v200_v22 }
  0x3b   :  { %801 = vmatmul.mubr.f32.vlgmr.msra.gmra.mxu1 %v151_v27  ;;  %809 = vmatprep.subr.mxu0 %v207_v23 }
  0x3c   :  { %814 = vmatprep.subr.mxu1 %v997_v3  ;;  %810 = vmatpush3.msra.mxu0 %v207_v23 }
  0x3d   :  { %811 = vmatprep.mubr.f32.mxu0 %v1012_v13  ;;  %815 = vmatpush3.msra.mxu1 %v997_v3 }
  0x3e   :  { %812 = vmatmul.mubr.f32.vlgmr.msra.gmra.mxu0 %v1015_v15  ;;  %816 = vmatprep.subr.mxu1 %v999_v4 }
  0x3f   :  { %822 = vmatprep.mubr.f32.mxu1 %v1012_v13  ;;  %817 = vmatpush3.msra.mxu1 %v999_v4 }
  0x40   :  { %818 = vmatprep.subr.mxu1 %v1001_v5 }
  0x41   :  { %819 = vmatpush3.msra.mxu1 %v1001_v5 }
  0x42   :  { %820 = vmatprep.subr.mxu1 %v1006_v9 }
  0x43   :  { %821 = vmatpush3.msra.mxu1 %v1006_v9 }
  0x44   :  { %823 = vmatmul.mubr.f32.vlgmr.msra.gmra.mxu1 %v1015_v15 }
  0xec   :  { %v769_v38 = vpop.f32.mrf.mxu0 }
  0xed   :  { %v156_v42 = vadd.f32 %v769_v38, %v722_v39 }
  0xee   :  { %v145_v40 = vpop.f32.mrf.mxu0 }
  0xef   :  { %v146_v43 = vadd.f32 %v722_v39, %v145_v40 }
  0xf0   :  { %v780_v41 = vpop.f32.mrf.mxu1 }
  0xf1   :  { %v253_v46 = vadd.f32 %v780_v41, %v156_v42  ;;  %v661_v41 = vld [vmem:[#allocation5 + $0x8] sm:$0xff] }
  0xf2   :  { %v246_v44 = vpop.f32.mrf.mxu1 }
  0xf3   :  { %v247_v48 = vadd.f32 %v246_v44, %v146_v43 }
  0xf4   :  { %v791_v45 = vpop.f32.mrf.mxu0 }
  0xf5   :  { %v340_v50 = vadd.f32 %v791_v45, %v253_v46 }
  0xf6   :  { %v332_v49 = vpop.f32.mrf.mxu0 }
  0xf7   :  { %v333_v53 = vadd.f32 %v332_v49, %v247_v48 }
  0xfb   :  { %v802_v47 = vpop.f32.mrf.mxu1 }
  0xfc   :  { %v425_v54 = vadd.f32 %v802_v47, %v340_v50 }
  0xfd   :  { %v416_v51 = vpop.f32.mrf.mxu1 }
  0xfe   :  { %v813_v52 = vpop.f32.mrf.mxu0  ;;  %v417_v55 = vadd.f32 %v416_v51, %v333_v53 }
  0xff   :  { %v514_v57 = vadd.f32 %v813_v52, %v425_v54 }
 0x100   :  { %v507_v56 = vpop.f32.mrf.mxu0 }
 0x101   :  { %v508_v59 = vadd.f32 %v507_v56, %v417_v55 }
 0x104   :  { %v824_v58 = vpop.f32.mrf.mxu1 }
 0x105   :  { %v1053_v60 = vadd.f32 %v824_v58, %v514_v57 }
 0x106   :  { %v588_v61 = vpop.f32.mrf.mxu1 }
 0x107   :  { %v605_v62 = vand.u32 2147483647, %v1053_v60  ;;  %v1056_v63 = vadd.f32 %v588_v61, %v508_v59  ;;  %v599_v19 = vmax.f32 %v1053_v60, 0.0  ;;  %vm601_vm3 = vcmp.ne.f32.partialorder %v1053_v60, %v1053_v60 }
 0x109   :  { %v607_v0 = vsub.f32 0.0, %v605_v62  ;;  %v604_v1 = vand.u32 2147483647, %v1056_v63  ;;  %636 = vrot.lane.b32.xlu1 %v1056_v63, %s937_s2  ;;  %v598_v24 = vmax.f32 %v1056_v63, 0.0  ;;  %vm600_vm4 = vcmp.ne.f32.partialorder %v1056_v63, %v1056_v63 }
 0x10b   :  { %v610_v2 = vmul.f32 1.442695, %v607_v0  ;;  %v606_v3 = vsub.f32 0.0, %v604_v1 }
 0x10d   :  { %833 = vpow2.f32 %v610_v2  ;;  %v608_v4 = vmul.f32 1.442695, %v606_v3  ;;  %638 = vrot.lane.b32.xlu1 %v1053_v60, %s937_s2 }
 0x10f   :  { %835 = vpow2.f32 %v608_v4 }
 0x11a   :  { %v834_v5 = vpop.eup %833 }
 0x11b   :  { %v621_v6 = vadd.f32 1.0, %v834_v5  ;;  %v624_v9 = vmul.f32 -0.5, %v834_v5  ;;  %v627_v12 = vand.u32 2147483647, %v834_v5 }
 0x11c   :  { %v836_v7 = vpop.eup %835 }
 0x11d   :  { %837 = vlog2.f32 %v621_v6  ;;  %v612_v8 = vadd.f32 1.0, %v836_v7  ;;  %v615_v10 = vmul.f32 -0.5, %v836_v7  ;;  %v625_v11 = vadd.f32 1.0, %v624_v9 }
 0x11e   :  { %v618_v15 = vand.u32 2147483647, %v836_v7  ;;  %vm628_vm1 = vcmp.lt.f32.partialorder %v627_v12, 0.0004427343 }
 0x11f   :  { %839 = vlog2.f32 %v612_v8  ;;  %v616_v13 = vadd.f32 1.0, %v615_v10  ;;  %v626_v17 = vmul.f32 %v834_v5, %v625_v11 }
 0x120   :  { %vm619_vm2 = vcmp.lt.f32.partialorder %v618_v15, 0.0004427343 }
 0x121   :  { %v617_v22 = vmul.f32 %v836_v7, %v616_v13 }
 0x12a   :  { %v838_v14 = vpop.eup %837 }
 0x12b   :  { %v623_v16 = vmul.f32 0.6931472, %v838_v14 }
 0x12c   :  { %v840_v18 = vpop.eup %839 }
 0x12d   :  { %v629_v20 = vsel %vm628_vm1, %v626_v17, %v623_v16  ;;  %v614_v21 = vmul.f32 0.6931472, %v840_v18 }
 0x12e   :  { %v631_v23 = vadd.f32 %v629_v20, %v599_v19 }
 0x12f   :  { %v620_v25 = vsel %vm619_vm2, %v617_v22, %v614_v21 }
 0x130   :  { %v633_v26 = vsel %vm601_vm3, %v1053_v60, %v631_v23  ;;  %v630_v27 = vadd.f32 %v620_v25, %v598_v24 }
 0x131   :  { %645 = vst.msk [vmem:[%s1105_s6 + $0x8] sm:$0xff] %vm63_vm0, %v633_v26  ;;  %841 = vrsqrt.f32 %v633_v26  ;;  %vm655_vm6 = vcmp.eq.f32.partialorder %v633_v26, inf  ;;  %v658_v38 = vand.u32 2147483648, %v633_v26  ;;  %vm657_vm8 = vcmp.eq.f32.partialorder %v633_v26, 0.0 }
 0x132   :  { %v632_v28 = vsel %vm600_vm4, %v1056_v63, %v630_v27 }
 0x133   :  { %843 = vrsqrt.f32 %v632_v28  ;;  %644 = vst.msk [vmem:[%s1105_s6] sm:$0xff] %vm63_vm0, %v632_v28  ;;  %vm648_vm5 = vcmp.eq.f32.partialorder %v632_v28, inf  ;;  %v651_v33 = vand.u32 2147483648, %v632_v28  ;;  %vm650_vm7 = vcmp.eq.f32.partialorder %v632_v28, 0.0  ;;  %s939_s6 = smov [#allocation8]  }
 0x134   :  { %s701_s21 = sshll.u32 %s939_s6, 4  ;;  %s702_s21 = int_to_ptr.vmem [resolvable:$true] %s701_s21 }
 0x135   :  { %s885_s22 = scalar_lea.vmem %s702_s21, 256  ;;  %p890_p11 = scmp.lt.s32.totalorder %s702_s21, %s702_s21 }
 0x136   :  { %p886_p10 = scmp.ne.s32.totalorder %s702_s21, %s885_s22  ;;  %p891_p12 = scmp.lt.s32.totalorder %s885_s22, %s885_s22 }
 0x138   :  { %p892_p13 = por %p891_p12, %p890_p11 }
 0x13a   :  { %p893_p0 = pnand %p892_p13, %p886_p10 }
 0x13e   :  { %v842_v29 = vpop.eup %841 }
 0x13f   :  { %v654_v30 = vmul.f32 %v842_v29, %v633_v26 }
 0x140   :  { %v844_v31 = vpop.eup %843 }
 0x141   :  { %v647_v32 = vmul.f32 %v844_v31, %v632_v28  ;;  %v656_v36 = vsel %vm655_vm6, %v633_v26, %v654_v30 }
 0x142   :  { %v659_v40 = vsel %vm657_vm8, %v658_v38, %v656_v36 }
 0x143   :  { %v649_v35 = vsel %vm648_vm5, %v632_v28, %v647_v32  ;;  %v663_v42 = vmul.f32 %v661_v41, %v659_v40 }
 0x144   :  { %v652_v37 = vsel %vm650_vm7, %v651_v33, %v649_v35 }
 0x145   :  { %v662_v39 = vmul.f32 %v660_v34, %v652_v37 }
 0x147   :  { %666 = vrot.lane.b32.xlu0 %v662_v39, %s938_s20 }
 0x14b   :  { %668 = vrot.lane.b32.xlu0 %v663_v42, %s938_s20 }
 0x17b   :  { %v637_v43 = vpop.permute.xlu1 %636 }
 0x17c   :  { %642 = vst.msk [vmem:[#allocation8] sm:$0xff] %vm63_vm0, %v637_v43 }
 0x17f   :  { %v639_v44 = vpop.permute.xlu1 %638 }
 0x180   :  { %643 = vst.msk [vmem:[#allocation8 + $0x8] sm:$0xff] %vm63_vm0, %v639_v44 }
 0x181   :  { %896 = shalt.err (!%p893_p0)
}
 0x182   :  { %707 = dma.vmem_to_hbm [thread:$0]  %s702_s21, 256, %s1104_s5, [#allocation9], %s934_s24, %s934_s24, %s935_s25  }
 0x183   :  { %s940_s27 = smov [#allocation7]  }
 0x184   :  { %s689_s28 = sshll.u32 %s940_s27, 4  ;;  %s690_s28 = int_to_ptr.vmem [resolvable:$true] %s689_s28 }
 0x185   :  { %s905_s5 = scalar_lea.vmem %s690_s28, 256  ;;  %p910_p2 = scmp.lt.s32.totalorder %s690_s28, %s690_s28 }
 0x186   :  { %p906_p1 = scmp.ne.s32.totalorder %s690_s28, %s905_s5  ;;  %p911_p3 = scmp.lt.s32.totalorder %s905_s5, %s905_s5 }
 0x188   :  { %p912_p4 = por %p911_p3, %p910_p2 }
 0x18a   :  { %p913_p5 = pnand %p912_p4, %p906_p1 }
 0x1b9   :  { %v667_v45 = vpop.permute.xlu0 %666 }
 0x1ba   :  { %v672_v46 = vadd.f32 %v667_v45, %v1056_v63 }
 0x1bc   :  { %676 = vrot.lane.b32.xlu0 %v672_v46, %s937_s2 }
 0x1bd   :  { %v669_v47 = vpop.permute.xlu0 %668 }
 0x1be   :  { %v673_v48 = vadd.f32 %v669_v47, %v1053_v60 }
 0x1c0   :  { %678 = vrot.lane.b32.xlu1 %v673_v48, %s937_s2 }
 0x22e   :  { %v677_v49 = vpop.permute.xlu0 %676 }
 0x22f   :  { %682 = vst.msk [vmem:[#allocation7] sm:$0xff] %vm63_vm0, %v677_v49 }
 0x232   :  { %v679_v50 = vpop.permute.xlu1 %678 }
 0x233   :  { %683 = vst.msk [vmem:[#allocation7 + $0x8] sm:$0xff] %vm63_vm0, %v679_v50 }
 0x234   :  { %916 = shalt.err (!%p913_p5)
}
 0x235   :  { %695 = dma.vmem_to_hbm [thread:$0]  %s690_s28, 256, %s1103_s4, [#allocation4], %s934_s24, %s934_s24, %s935_s25  }
 0x236   :  { %929 = dma.done.wait [#allocation4], 256  }
 0x237   :  { %930 = vsyncadd [#allocation4], 4294967040 }
 0x238   :  { %931 = dma.done.wait [#allocation9], 256  }
 0x239   :  { %932 = vsyncadd [#allocation9], 4294967040 }
 0x23a   :  { %718 = vsyncpa [#allocation3], 1 }
 0x23b   :  { %719 = vsyncpa [#allocation6], 1 }
 0x23c   :  { %720 = vsyncpa [#allocation4], 1 }
 0x23d   :  { %721 = vsyncpa [#allocation9], 1 }

</bundles_post_ra>
